<compile_context>
chip_gen: v7x
topology: tpu7x:2x2x1
jax: 0.10.0
libtpu: 0.0.40
codegen_flags: <defaults>
</compile_context>

<pallas_src>
import functools

import jax
import jax.numpy as jnp
from jax.experimental import pallas as pl
from jax.experimental.pallas import tpu as pltpu


def _round_up(n, m):
    return (n + m - 1) // m * m


def mlp_kernel(x_ref,
               w1_ref, b1_ref,
               w2_ref, b2_ref,
               w3_ref, b3_ref,
               w4_ref, b4_ref,
               w5t_ref, b5_ref,
               o_ref,
               xpad_ref,
               *, n_feat):
    # ---- Stage the narrow (tb, n_feat) f32 input tile into a lane-dense
    #      (tb, 128) bf16 VMEM scratch (pad lanes zeroed so they hit the
    #      zero-padded weight rows exactly). ----
    xpad_ref[...] = jnp.zeros_like(xpad_ref)
    xpad_ref[:, :n_feat] = x_ref[...].astype(jnp.bfloat16)

    # layer1 + ReLU  (bf16 operands -> MXU, f32 accumulate, bf16 activation out)
    h = jnp.dot(xpad_ref[...], w1_ref[...], preferred_element_type=jnp.float32)
    h = jnp.maximum(h + b1_ref[...], 0.0).astype(jnp.bfloat16)

    # layer2 + ReLU
    h = jnp.dot(h, w2_ref[...], preferred_element_type=jnp.float32)
    h = jnp.maximum(h + b2_ref[...], 0.0).astype(jnp.bfloat16)

    # layer3 + ReLU
    h = jnp.dot(h, w3_ref[...], preferred_element_type=jnp.float32)
    h = jnp.maximum(h + b3_ref[...], 0.0).astype(jnp.bfloat16)

    # layer4 + ReLU
    h = jnp.dot(h, w4_ref[...], preferred_element_type=jnp.float32)
    h = jnp.maximum(h + b4_ref[...], 0.0).astype(jnp.bfloat16)

    # output layer, transposed (batch on lanes): (8,128) x (tb,128)^T -> (8, tb)
    z = jax.lax.dot_general(
        w5t_ref[...], h,
        dimension_numbers=(((1,), (1,)), ((), ())),
        preferred_element_type=jnp.float32) + b5_ref[0, 0]

    # sigmoid: exp on EUP + approximate reciprocal on EUP (VALU stays clear)
    o_ref[...] = pl.reciprocal(1.0 + jnp.exp(-z), approx=True)


def init_params(key, n_input_features):
    """Deterministic init mimicking PyTorch nn.Linear default (uniform ±1/sqrt(fan_in)).

    Returns list of (W[in, out] f32, b[1, out] f32) per layer.
    """
    dims = [n_input_features, 360, 180, 90, 45, 1]
    params = []
    for i in range(len(dims) - 1):
        fan_in, fan_out = dims[i], dims[i + 1]
        key, kw, kb = jax.random.split(key, 3)
        bound = 1.0 / (fan_in ** 0.5)
        w = jax.random.uniform(kw, (fan_in, fan_out), jnp.float32, -bound, bound)
        b = jax.random.uniform(kb, (1, fan_out), jnp.float32, -bound, bound)
        params.append((w, b))
    return params


def pad_params(params):
    """Pad layers 1..4 to 128-lane multiples (bf16 weights, f32 biases).

    The final layer (fan_out == 1) is stored transposed as an (8, in_pad) bf16
    tile whose row 0 holds the real neuron, plus a (1, 1) f32 scalar bias
    (placed in SMEM by the wrapper).
    """
    padded = []
    last = len(params) - 1
    for idx, (w, b) in enumerate(params):
        fi, fo = w.shape
        fi_p = _round_up(fi, 128)
        if idx == last:
            assert fo == 1, "final layer must have a single output neuron"
            wt = jnp.zeros((8, fi_p), jnp.bfloat16).at[0, :fi].set(
                w[:, 0].astype(jnp.bfloat16))
            bp = b.reshape(1, 1).astype(jnp.float32)
            padded.append((wt, bp))
        else:
            fo_p = _round_up(fo, 128)
            wp = jnp.zeros((fi_p, fo_p), jnp.bfloat16).at[:fi, :fo].set(
                w.astype(jnp.bfloat16))
            bp = jnp.zeros((1, fo_p), jnp.float32).at[:, :fo].set(b)
            padded.append((wp, bp))
    return padded


def neural_network_forward(x, padded_params, tb=256):
    """x: [B, n_input_features] f32.  padded_params: output of pad_params.

    tb: max batch tile (rows per grid step).  256 is safe on all generations;
    512 is a free win on v6e/v7x for large batches.
    """
    B, F = x.shape
    f1_pad = padded_params[0][0].shape[0]         # layer-1 padded input width (128)

    # ---- Batch tiling: multiple of 8 sublanes; ensure >=2 grid steps when
    #      B >= 16 so v7x's 2 TensorCores both get work. ----
    b8 = _round_up(B, 8)
    tb_eff = min(tb, b8)
    if 16 <= b8 <= tb:
        tb_eff = _round_up(b8 // 2, 8)
    b_pad = _round_up(B, tb_eff)

    # Only pad batch rows if needed (tiny: F=13 columns).  No feature padding,
    # no dtype cast in the wrapper — the kernel handles both.
    x_p = x if b_pad == B else jnp.zeros((b_pad, F), x.dtype).at[:B].set(x)

    flat_params = [p for wb in padded_params for p in wb]

    in_specs = [pl.BlockSpec((tb_eff, F), lambda i: (i, 0))]          # x (narrow)
    for p in flat_params[:-1]:                                        # w1..w4,b1..b4,w5t
        in_specs.append(pl.BlockSpec(p.shape, lambda i: (0, 0)))      # VMEM-resident
    in_specs.append(pl.BlockSpec(memory_space=pltpu.MemorySpace.SMEM))  # b5 scalar

    kernel = functools.partial(mlp_kernel, n_feat=F)

    out = pl.pallas_call(
        kernel,
        out_shape=jax.ShapeDtypeStruct((8, b_pad), jnp.float32),
        grid=(b_pad // tb_eff,),
        in_specs=in_specs,
        out_specs=pl.BlockSpec((8, tb_eff), lambda i: (0, i)),
        scratch_shapes=[pltpu.VMEM((tb_eff, f1_pad), jnp.bfloat16)],
        compiler_params=pltpu.CompilerParams(
            dimension_semantics=("parallel",)),
    )(x_p, *flat_params)

    # Row 0 of the transposed output slab holds the real neuron.
    return out[0, :B, None]


def reference_forward(x, params):
    """Pure-JAX reference with the same numerics (bf16 operands, f32 accumulate)."""
    h = x
    for i, (w, b) in enumerate(params):
        h = jnp.dot(h.astype(jnp.bfloat16), w.astype(jnp.bfloat16),
                    preferred_element_type=jnp.float32) + b
        if i < len(params) - 1:
            h = jnp.maximum(h, 0.0)
        else:
            h = jax.nn.sigmoid(h)
    return h


if __name__ == "__main__":
    key = jax.random.PRNGKey(0)
    n_input_features = 13   # classic heart-disease feature count
    batch = 8

    key, kx = jax.random.split(key)
    x = jax.random.normal(kx, (batch, n_input_features), dtype=jnp.float32)

    params = init_params(key, n_input_features)
    padded_params = pad_params(params)

    out = neural_network_forward(x, padded_params)
    out = jax.block_until_ready(out)

    ref = reference_forward(x, params)
    assert out.shape == (batch, 1)
    assert jnp.allclose(out, ref, atol=5e-3, rtol=5e-3), (
        f"max abs diff = {jnp.max(jnp.abs(out - ref))}")

    print("KERNEL_OK")
</pallas_src>

<mosaic_0001>
module attributes {stable_mosaic.version = 11 : i64} {
  func.func @mlp_kernel(%arg0: i32, %arg1: memref<8x13xf32, #tpu.memory_space<vmem>>, %arg2: memref<128x384xbf16, #tpu.memory_space<vmem>>, %arg3: memref<1x384xf32, #tpu.memory_space<vmem>>, %arg4: memref<384x256xbf16, #tpu.memory_space<vmem>>, %arg5: memref<1x256xf32, #tpu.memory_space<vmem>>, %arg6: memref<256x128xbf16, #tpu.memory_space<vmem>>, %arg7: memref<1x128xf32, #tpu.memory_space<vmem>>, %arg8: memref<128x128xbf16, #tpu.memory_space<vmem>>, %arg9: memref<1x128xf32, #tpu.memory_space<vmem>>, %arg10: memref<8x128xbf16, #tpu.memory_space<vmem>>, %arg11: memref<1x1xf32, #tpu.memory_space<smem>>, %arg12: memref<8x8xf32, #tpu.memory_space<vmem>>, %arg13: memref<8x128xbf16, #tpu.memory_space<vmem>>) attributes {dimension_semantics = [#tpu.dimension_semantics<parallel>], iteration_bounds = array<i64: 1>, scalar_prefetch = 0 : i64, scratch_operands = 1 : i64, tpu.core_type = #tpu.core_type<tc>, window_params = [{transform_indices = @transform_0, window_bounds = array<i64: 8, 13>}, {pipeline_mode = #tpu.pipeline_mode<synchronous>, transform_indices = @transform_1, window_bounds = array<i64: 128, 384>}, {pipeline_mode = #tpu.pipeline_mode<synchronous>, transform_indices = @transform_2, window_bounds = array<i64: 1, 384>}, {pipeline_mode = #tpu.pipeline_mode<synchronous>, transform_indices = @transform_3, window_bounds = array<i64: 384, 256>}, {pipeline_mode = #tpu.pipeline_mode<synchronous>, transform_indices = @transform_4, window_bounds = array<i64: 1, 256>}, {pipeline_mode = #tpu.pipeline_mode<synchronous>, transform_indices = @transform_5, window_bounds = array<i64: 256, 128>}, {pipeline_mode = #tpu.pipeline_mode<synchronous>, transform_indices = @transform_6, window_bounds = array<i64: 1, 128>}, {pipeline_mode = #tpu.pipeline_mode<synchronous>, transform_indices = @transform_7, window_bounds = array<i64: 128, 128>}, {pipeline_mode = #tpu.pipeline_mode<synchronous>, transform_indices = @transform_8, window_bounds = array<i64: 1, 128>}, {pipeline_mode = #tpu.pipeline_mode<synchronous>, transform_indices = @transform_9, window_bounds = array<i64: 8, 128>}, {transform_indices = @transform_10, window_bounds = array<i64: 1, 1>}, {transform_indices = @transform_11, window_bounds = array<i64: 8, 8>}]} {
    %cst = arith.constant 0.000000e+00 : bf16
    %0 = vector.broadcast %cst : bf16 to vector<8x128xbf16>
    %c0 = arith.constant 0 : index
    %c0_0 = arith.constant 0 : index
    %1 = vector.load %arg13[%c0, %c0_0] : memref<8x128xbf16, #tpu.memory_space<vmem>>, vector<8x128xbf16>
    tpu.vector_store %arg13[%c0, %c0_0], %0 {strides = array<i32>} : memref<8x128xbf16, #tpu.memory_space<vmem>>, vector<8x128xbf16>,
    %c0_1 = arith.constant 0 : index
    %c0_2 = arith.constant 0 : index
    %2 = vector.load %arg1[%c0_1, %c0_2] : memref<8x13xf32, #tpu.memory_space<vmem>>, vector<8x13xf32>
    %3 = arith.truncf %2 : vector<8x13xf32> to vector<8x13xbf16>
    %c0_3 = arith.constant 0 : index
    %c0_4 = arith.constant 0 : index
    %4 = vector.load %arg13[%c0_3, %c0_4] : memref<8x128xbf16, #tpu.memory_space<vmem>>, vector<8x13xbf16>
    tpu.vector_store %arg13[%c0_3, %c0_4], %3 {strides = array<i32>} : memref<8x128xbf16, #tpu.memory_space<vmem>>, vector<8x13xbf16>,
    %c0_5 = arith.constant 0 : index
    %c0_6 = arith.constant 0 : index
    %5 = vector.load %arg13[%c0_5, %c0_6] : memref<8x128xbf16, #tpu.memory_space<vmem>>, vector<8x128xbf16>
    %c0_7 = arith.constant 0 : index
    %c0_8 = arith.constant 0 : index
    %6 = vector.load %arg2[%c0_7, %c0_8] : memref<128x384xbf16, #tpu.memory_space<vmem>>, vector<128x384xbf16>
    %cst_9 = arith.constant dense<0.000000e+00> : vector<8x384xf32>
    %7 = tpu.matmul %5, %6, %cst_9 {dimension_numbers = #tpu.dot_dimension_numbers<[1], [0], [0], [1], [0, 0, 1, 1], [], []>} : vector<8x128xbf16>, vector<128x384xbf16>, vector<8x384xf32> -> vector<8x384xf32>
    %c0_10 = arith.constant 0 : index
    %c0_11 = arith.constant 0 : index
    %8 = vector.load %arg3[%c0_10, %c0_11] : memref<1x384xf32, #tpu.memory_space<vmem>>, vector<1x384xf32>
    %9 = vector.broadcast %8 : vector<1x384xf32> to vector<8x384xf32>
    %10 = arith.addf %7, %9 : vector<8x384xf32>
    %cst_12 = arith.constant 0.000000e+00 : f32
    %11 = vector.broadcast %cst_12 : f32 to vector<8x384xf32>
    %12 = arith.maximumf %10, %11 : vector<8x384xf32>
    %13 = arith.truncf %12 : vector<8x384xf32> to vector<8x384xbf16>
    %c0_13 = arith.constant 0 : index
    %c0_14 = arith.constant 0 : index
    %14 = vector.load %arg4[%c0_13, %c0_14] : memref<384x256xbf16, #tpu.memory_space<vmem>>, vector<384x256xbf16>
    %cst_15 = arith.constant dense<0.000000e+00> : vector<8x256xf32>
    %15 = tpu.matmul %13, %14, %cst_15 {dimension_numbers = #tpu.dot_dimension_numbers<[1], [0], [0], [1], [0, 0, 1, 1], [], []>} : vector<8x384xbf16>, vector<384x256xbf16>, vector<8x256xf32> -> vector<8x256xf32>
    %c0_16 = arith.constant 0 : index
    %c0_17 = arith.constant 0 : index
    %16 = vector.load %arg5[%c0_16, %c0_17] : memref<1x256xf32, #tpu.memory_space<vmem>>, vector<1x256xf32>
    %17 = vector.broadcast %16 : vector<1x256xf32> to vector<8x256xf32>
    %18 = arith.addf %15, %17 : vector<8x256xf32>
    %cst_18 = arith.constant 0.000000e+00 : f32
    %19 = vector.broadcast %cst_18 : f32 to vector<8x256xf32>
    %20 = arith.maximumf %18, %19 : vector<8x256xf32>
    %21 = arith.truncf %20 : vector<8x256xf32> to vector<8x256xbf16>
    %c0_19 = arith.constant 0 : index
    %c0_20 = arith.constant 0 : index
    %22 = vector.load %arg6[%c0_19, %c0_20] : memref<256x128xbf16, #tpu.memory_space<vmem>>, vector<256x128xbf16>
    %cst_21 = arith.constant dense<0.000000e+00> : vector<8x128xf32>
    %23 = tpu.matmul %21, %22, %cst_21 {dimension_numbers = #tpu.dot_dimension_numbers<[1], [0], [0], [1], [0, 0, 1, 1], [], []>} : vector<8x256xbf16>, vector<256x128xbf16>, vector<8x128xf32> -> vector<8x128xf32>
    %c0_22 = arith.constant 0 : index
    %c0_23 = arith.constant 0 : index
    %24 = vector.load %arg7[%c0_22, %c0_23] : memref<1x128xf32, #tpu.memory_space<vmem>>, vector<1x128xf32>
    %25 = vector.broadcast %24 : vector<1x128xf32> to vector<8x128xf32>
    %26 = arith.addf %23, %25 : vector<8x128xf32>
    %cst_24 = arith.constant 0.000000e+00 : f32
    %27 = vector.broadcast %cst_24 : f32 to vector<8x128xf32>
    %28 = arith.maximumf %26, %27 : vector<8x128xf32>
    %29 = arith.truncf %28 : vector<8x128xf32> to vector<8x128xbf16>
    %c0_25 = arith.constant 0 : index
    %c0_26 = arith.constant 0 : index
    %30 = vector.load %arg8[%c0_25, %c0_26] : memref<128x128xbf16, #tpu.memory_space<vmem>>, vector<128x128xbf16>
    %cst_27 = arith.constant dense<0.000000e+00> : vector<8x128xf32>
    %31 = tpu.matmul %29, %30, %cst_27 {dimension_numbers = #tpu.dot_dimension_numbers<[1], [0], [0], [1], [0, 0, 1, 1], [], []>} : vector<8x128xbf16>, vector<128x128xbf16>, vector<8x128xf32> -> vector<8x128xf32>
    %c0_28 = arith.constant 0 : index
    %c0_29 = arith.constant 0 : index
    %32 = vector.load %arg9[%c0_28, %c0_29] : memref<1x128xf32, #tpu.memory_space<vmem>>, vector<1x128xf32>
    %33 = vector.broadcast %32 : vector<1x128xf32> to vector<8x128xf32>
    %34 = arith.addf %31, %33 : vector<8x128xf32>
    %cst_30 = arith.constant 0.000000e+00 : f32
    %35 = vector.broadcast %cst_30 : f32 to vector<8x128xf32>
    %36 = arith.maximumf %34, %35 : vector<8x128xf32>
    %37 = arith.truncf %36 : vector<8x128xf32> to vector<8x128xbf16>
    %c0_31 = arith.constant 0 : index
    %c0_32 = arith.constant 0 : index
    %38 = vector.load %arg10[%c0_31, %c0_32] : memref<8x128xbf16, #tpu.memory_space<vmem>>, vector<8x128xbf16>
    %cst_33 = arith.constant dense<0.000000e+00> : vector<8x8xf32>
    %39 = tpu.matmul %38, %37, %cst_33 {dimension_numbers = #tpu.dot_dimension_numbers<[1], [1], [0], [0], [0, 0, 1, 0], [], []>} : vector<8x128xbf16>, vector<8x128xbf16>, vector<8x8xf32> -> vector<8x8xf32>
    %c0_34 = arith.constant 0 : index
    %c0_35 = arith.constant 0 : index
    %40 = memref.load %arg11[%c0_34, %c0_35] : memref<1x1xf32, #tpu.memory_space<smem>>
    %41 = vector.broadcast %40 : f32 to vector<8x8xf32>
    %42 = arith.addf %39, %41 : vector<8x8xf32>
    %cst_36 = arith.constant 0.000000e+00 : f32
    %43 = vector.broadcast %cst_36 : f32 to vector<8x8xf32>
    %44 = arith.subf %43, %42 : vector<8x8xf32>
    %45 = math.exp %44 : vector<8x8xf32>
    %cst_37 = arith.constant 1.000000e+00 : f32
    %46 = vector.broadcast %cst_37 : f32 to vector<8x8xf32>
    %47 = arith.addf %46, %45 : vector<8x8xf32>
    %48 = tpu.reciprocal %47 {approx = true} : vector<8x8xf32> -> vector<8x8xf32>
    %c0_38 = arith.constant 0 : index
    %c0_39 = arith.constant 0 : index
    %49 = vector.load %arg12[%c0_38, %c0_39] : memref<8x8xf32, #tpu.memory_space<vmem>>, vector<8x8xf32>
    tpu.vector_store %arg12[%c0_38, %c0_39], %48 {strides = array<i32>} : memref<8x8xf32, #tpu.memory_space<vmem>>, vector<8x8xf32>,
    return
  }
  func.func @transform_0(%arg0: i32) -> (i32, i32) {
    %c0_i32 = arith.constant 0 : i32
    %c0_i32_0 = arith.constant 0 : i32
    return %arg0, %c0_i32 : i32, i32
  }
  func.func @transform_1(%arg0: i32) -> (i32, i32) {
    %c0_i32 = arith.constant 0 : i32
    %c0_i32_0 = arith.constant 0 : i32
    %c0_i32_1 = arith.constant 0 : i32
    return %c0_i32, %c0_i32_0 : i32, i32
  }
  func.func @transform_2(%arg0: i32) -> (i32, i32) {
    %c0_i32 = arith.constant 0 : i32
    %c0_i32_0 = arith.constant 0 : i32
    %c0_i32_1 = arith.constant 0 : i32
    return %c0_i32, %c0_i32_0 : i32, i32
  }
  func.func @transform_3(%arg0: i32) -> (i32, i32) {
    %c0_i32 = arith.constant 0 : i32
    %c0_i32_0 = arith.constant 0 : i32
    %c0_i32_1 = arith.constant 0 : i32
    return %c0_i32, %c0_i32_0 : i32, i32
  }
  func.func @transform_4(%arg0: i32) -> (i32, i32) {
    %c0_i32 = arith.constant 0 : i32
    %c0_i32_0 = arith.constant 0 : i32
    %c0_i32_1 = arith.constant 0 : i32
    return %c0_i32, %c0_i32_0 : i32, i32
  }
  func.func @transform_5(%arg0: i32) -> (i32, i32) {
    %c0_i32 = arith.constant 0 : i32
    %c0_i32_0 = arith.constant 0 : i32
    %c0_i32_1 = arith.constant 0 : i32
    return %c0_i32, %c0_i32_0 : i32, i32
  }
  func.func @transform_6(%arg0: i32) -> (i32, i32) {
    %c0_i32 = arith.constant 0 : i32
    %c0_i32_0 = arith.constant 0 : i32
    %c0_i32_1 = arith.constant 0 : i32
    return %c0_i32, %c0_i32_0 : i32, i32
  }
  func.func @transform_7(%arg0: i32) -> (i32, i32) {
    %c0_i32 = arith.constant 0 : i32
    %c0_i32_0 = arith.constant 0 : i32
    %c0_i32_1 = arith.constant 0 : i32
    return %c0_i32, %c0_i32_0 : i32, i32
  }
  func.func @transform_8(%arg0: i32) -> (i32, i32) {
    %c0_i32 = arith.constant 0 : i32
    %c0_i32_0 = arith.constant 0 : i32
    %c0_i32_1 = arith.constant 0 : i32
    return %c0_i32, %c0_i32_0 : i32, i32
  }
  func.func @transform_9(%arg0: i32) -> (i32, i32) {
    %c0_i32 = arith.constant 0 : i32
    %c0_i32_0 = arith.constant 0 : i32
    %c0_i32_1 = arith.constant 0 : i32
    return %c0_i32, %c0_i32_0 : i32, i32
  }
  func.func @transform_10(%arg0: i32) -> (i32, i32) {
    %c0_i32 = arith.constant 0 : i32
    %c0_i32_0 = arith.constant 0 : i32
    %c0_i32_1 = arith.constant 0 : i32
    return %c0_i32, %c0_i32_0 : i32, i32
  }
  func.func @transform_11(%arg0: i32) -> (i32, i32) {
    %c0_i32 = arith.constant 0 : i32
    %c0_i32_0 = arith.constant 0 : i32
    return %c0_i32, %arg0 : i32, i32
  }
}

</mosaic_0001>

<bundles_post_ra>
// kernel: tpu_custom_call.1
= control target key start
LH: loop header
LB: loop body
LE: loop exit
PB: predicated region body
PF: predicated region fallthrough
CT: control target
= control target key end

     0   :  { %17 = vsyncpa [#allocation5], 0  ;;  %s1816_s0 = inlined_call_operand.hbm [shape: f32[8,13], index: 0, kind: input, shape index: {}]   ;;  %s1817_s1 = inlined_call_operand.hbm [shape: bf16[128,384], index: 1, kind: input, shape index: {}]   ;;  %s1818_s2 = inlined_call_operand.vmem [shape: f32[1,384], index: 2, kind: input, shape index: {}]   ;;  %s1819_s3 = inlined_call_operand.hbm [shape: bf16[384,256], index: 3, kind: input, shape index: {}]   ;;  %s1820_s4 = inlined_call_operand.vmem [shape: f32[1,256], index: 4, kind: input, shape index: {}]   ;;  %s1821_s5 = inlined_call_operand.hbm [shape: bf16[256,128], index: 5, kind: input, shape index: {}]   ;;  %s1822_s6 = inlined_call_operand.vmem [shape: f32[1,128], index: 6, kind: input, shape index: {}]   ;;  %s1823_s7 = inlined_call_operand.hbm [shape: bf16[128,128], index: 7, kind: input, shape index: {}]   ;;  %s1824_s8 = inlined_call_operand.vmem [shape: f32[1,128], index: 8, kind: input, shape index: {}]   ;;  %s1825_s9 = inlined_call_operand.vmem [shape: bf16[8,128], index: 9, kind: input, shape index: {}]   ;;  %s1826_s10 = inlined_call_operand.<no memory space> [shape: f32[1,1], index: 10, kind: input, shape index: {}]   ;;  %s1827_s11 = inlined_call_operand.hbm [shape: f32[8,8], index: 11, kind: output, shape index: {}]  }
   0x1   :  { %18 = vsyncpa [#allocation8], 0 }
   0x2   :  { %19 = vsyncpa [#allocation11], 0 }
   0x3   :  { %20 = vsyncpa [#allocation6], 0  ;;  %s1599_s17 = smov [#allocation7]   ;;  %s1459_s21 = scalar_lea.hbm %s1817_s1, 3072 }
   0x4   :  { %s36_s18 = sshll.u32 %s1599_s17, 4  ;;  %p1460_p0 = scmp.ne.s32.totalorder %s1817_s1, %s1459_s21  ;;  %s37_s18 = int_to_ptr.vmem [resolvable:$true] %s36_s18 }
   0x5   :  { %p1463_p1 = scmp.lt.u32.totalorder %s1459_s21, %s1817_s1 }
   0x7   :  { %p1465_p2 = pnand %p1463_p1, %p1460_p0 }
   0x9   :  { %1468 = shalt.err (!%p1465_p2)
}
   0xa   :  { %s1469_s26 = scalar_lea.vmem %s37_s18, 3072  ;;  %p1474_p4 = scmp.lt.s32.totalorder %s37_s18, %s37_s18 }
   0xb   :  { %p1470_p3 = scmp.ne.s32.totalorder %s37_s18, %s1469_s26  ;;  %p1475_p5 = scmp.lt.s32.totalorder %s1469_s26, %s1469_s26 }
   0xd   :  { %p1476_p6 = por %p1475_p5, %p1474_p4 }
   0xf   :  { %p1477_p7 = pnand %p1476_p6, %p1470_p3 }
  0x11   :  { %1480 = shalt.err (!%p1477_p7)
}
  0x12   :  { %s1600_s27 = smov 192   ;;  %s1601_s28 = smov 12  }
  0x13   :  { %42 = dma.hbm_to_vmem [thread:$0]  %s1817_s1, 3072, %s37_s18, [#allocation8], %s1600_s27, %s1600_s27, %s1601_s28  }
  0x14   :  { %s1602_s12 = smov [#allocation10]   ;;  %s1481_s16 = scalar_lea.hbm %s1821_s5, 2048 }
  0x15   :  { %s64_s13 = sshll.u32 %s1602_s12, 4  ;;  %p1482_p8 = scmp.ne.s32.totalorder %s1821_s5, %s1481_s16  ;;  %s65_s13 = int_to_ptr.vmem [resolvable:$true] %s64_s13 }
  0x16   :  { %p1485_p9 = scmp.lt.u32.totalorder %s1481_s16, %s1821_s5 }
  0x18   :  { %p1487_p10 = pnand %p1485_p9, %p1482_p8 }
  0x1a   :  { %1490 = shalt.err (!%p1487_p10)
}
  0x1b   :  { %s1491_s22 = scalar_lea.vmem %s65_s13, 2048  ;;  %p1496_p12 = scmp.lt.s32.totalorder %s65_s13, %s65_s13 }
  0x1c   :  { %p1492_p11 = scmp.ne.s32.totalorder %s65_s13, %s1491_s22  ;;  %p1497_p13 = scmp.lt.s32.totalorder %s1491_s22, %s1491_s22 }
  0x1e   :  { %p1498_p0 = por %p1497_p13, %p1496_p12 }
  0x20   :  { %p1499_p1 = pnand %p1498_p0, %p1492_p11 }
  0x22   :  { %1502 = shalt.err (!%p1499_p1)
}
  0x23   :  { %s1603_s1 = smov 64   ;;  %s1604_s18 = smov 4  }
  0x24   :  { %70 = dma.hbm_to_vmem [thread:$0]  %s1821_s5, 2048, %s65_s13, [#allocation11], %s1603_s1, %s1603_s1, %s1604_s18  }
  0x25   :  { %s1605_s25 = smov [#allocation4]   ;;  %s1606_s27 = smov [#allocation9]  }
  0x26   :  { %s27_s26 = sshll.u32 %s1605_s25, 4  ;;  %s50_s28 = sshll.u32 %s1606_s27, 4  ;;  %s28_s26 = int_to_ptr.vmem [resolvable:$true] %s27_s26  ;;  %s1701_s28 = int_to_ptr.vmem [resolvable:$true] %s50_s28 }
  0x27   :  { %s1503_s12 = scalar_lea.hbm %s1816_s0, 128 }
  0x28   :  { %p1504_p2 = scmp.ne.s32.totalorder %s1816_s0, %s1503_s12  ;;  %p1507_p3 = scmp.lt.u32.totalorder %s1503_s12, %s1816_s0 }
  0x2a   :  { %p1509_p4 = pnand %p1507_p3, %p1504_p2 }
  0x2c   :  { %1512 = shalt.err (!%p1509_p4)
}
  0x2d   :  { %s1513_s5 = scalar_lea.vmem %s28_s26, 128  ;;  %p1518_p6 = scmp.lt.s32.totalorder %s28_s26, %s28_s26 }
  0x2e   :  { %p1514_p5 = scmp.ne.s32.totalorder %s28_s26, %s1513_s5  ;;  %p1519_p7 = scmp.lt.s32.totalorder %s1513_s5, %s1513_s5 }
  0x30   :  { %p1520_p8 = por %p1519_p7, %p1518_p6 }
  0x32   :  { %p1521_p9 = pnand %p1520_p8, %p1514_p5 }
  0x34   :  { %1524 = shalt.err (!%p1521_p9)
}
  0x35   :  { %30 = dma.hbm_to_vmem [thread:$0]  %s1816_s0, 128, %s28_s26, [#allocation5]  }
  0x36   :  { %s1525_s22 = scalar_lea.hbm %s1819_s3, 6144 }
  0x37   :  { %p1526_p10 = scmp.ne.s32.totalorder %s1819_s3, %s1525_s22  ;;  %p1529_p11 = scmp.lt.u32.totalorder %s1525_s22, %s1819_s3 }
  0x39   :  { %p1531_p12 = pnand %p1529_p11, %p1526_p10 }
  0x3b   :  { %1534 = shalt.err (!%p1531_p12)
}
  0x3c   :  { %s1535_s29 = scalar_lea.vmem %s1701_s28, 6144  ;;  %p1540_p0 = scmp.lt.s32.totalorder %s1701_s28, %s1701_s28 }
  0x3d   :  { %p1536_p13 = scmp.ne.s32.totalorder %s1701_s28, %s1535_s29  ;;  %p1541_p1 = scmp.lt.s32.totalorder %s1535_s29, %s1535_s29 }
  0x3f   :  { %p1542_p2 = por %p1541_p1, %p1540_p0 }
  0x41   :  { %p1543_p3 = pnand %p1542_p2, %p1536_p13 }
  0x43   :  { %1546 = shalt.err (!%p1543_p3)
}
  0x44   :  { %s1607_s0 = smov 128   ;;  %s1608_s26 = smov 8  }
  0x45   :  { %56 = dma.hbm_to_vmem [thread:$0]  %s1819_s3, 6144, %s1701_s28, [#allocation8], %s1607_s0, %s1607_s0, %s1608_s26  }
  0x46   :  { %s1609_s14 = smov [#allocation12]   ;;  %s1547_s5 = scalar_lea.hbm %s1823_s7, 1024 }
  0x47   :  { %s78_s15 = sshll.u32 %s1609_s14, 4  ;;  %p1548_p4 = scmp.ne.s32.totalorder %s1823_s7, %s1547_s5  ;;  %s79_s15 = int_to_ptr.vmem [resolvable:$true] %s78_s15 }
  0x48   :  { %p1551_p5 = scmp.lt.u32.totalorder %s1547_s5, %s1823_s7 }
  0x4a   :  { %p1553_p6 = pnand %p1551_p5, %p1548_p4 }
  0x4c   :  { %1556 = shalt.err (!%p1553_p6)
}
  0x4d   :  { %s1557_s22 = scalar_lea.vmem %s79_s15, 1024  ;;  %p1562_p8 = scmp.lt.s32.totalorder %s79_s15, %s79_s15 }
  0x4e   :  { %p1558_p7 = scmp.ne.s32.totalorder %s79_s15, %s1557_s22  ;;  %p1563_p9 = scmp.lt.s32.totalorder %s1557_s22, %s1557_s22 }
  0x50   :  { %p1564_p10 = por %p1563_p9, %p1562_p8 }
  0x52   :  { %p1565_p11 = pnand %p1564_p10, %p1558_p7 }
  0x54   :  { %1568 = shalt.err (!%p1565_p11)
}
  0x55   :  { %84 = dma.hbm_to_vmem [thread:$0]  %s1823_s7, 1024, %s79_s15, [#allocation11], %s1603_s1, %s1603_s1, %s1604_s18  }
  0x56   :  { %1591 = dma.done.wait [#allocation5], 128  }
  0x57   :  { %1592 = vsyncadd [#allocation5], 4294967168 }
  0x58   :  { %1593 = dma.done.wait [#allocation8], 9216  }
  0x59   :  { %1594 = vsyncadd [#allocation8], 4294958080 }
  0x5a   :  { %1595 = dma.done.wait [#allocation11], 3072  }
  0x5b   :  { %1596 = vsyncadd [#allocation11], 4294964224  ;;  %v1610_v0 = vmov 0.0   ;;  %v1611_v1 = vmov 0   ;;  %vm1612_vm0 = vmmov 0   ;;  %v108_v10 = vld [vmem:[#allocation4] sm:$0xff] }
  0x5c   :  { %1260 = vmatprep.subr.bf16.mxu1 %v1610_v0  ;;  %107 = vst [vmem:[#allocation2] sm:$0xf] %v1611_v1  ;;  %322 = vmatprep.mubr.bf16.mxu0 %v1611_v1  ;;  %v1327_v2 = vld [vmem:[#allocation7 + $0x4] ss:$12 sps:$4 sm:$0xff]   ;;  %v1329_v3 = vld [vmem:[#allocation7] ss:$12 sps:$4 sm:$0xff]   ;;  %v109_v11 = vpack.c.bf16 %v108_v10, %v108_v10 }
  0x5d   :  { %1276 = vmatprep.mubr.msk.bf16.mxu1 %vm1612_vm0, %v1610_v0  ;;  %290 = vmatprep.subr.bf16.mxu0 %v1327_v2  ;;  %v1330_v4 = vld [vmem:[#allocation7 + $0x1c] ss:$12 sps:$4 sm:$0xff]   ;;  %v1332_v5 = vld [vmem:[#allocation7 + $0x18] ss:$12 sps:$4 sm:$0xff]   ;;  %v1333_v6 = vld [vmem:[#allocation7 + $0x34] ss:$12 sps:$4 sm:$0xff]  }
  0x5e   :  { %291 = vmatpush1.bf16.msra.mxu0 %v1329_v3  ;;  %v1335_v7 = vld [vmem:[#allocation7 + $0x30] ss:$12 sps:$4 sm:$0xff]   ;;  %v1336_v8 = vld [vmem:[#allocation7 + $0x4c] ss:$12 sps:$4 sm:$0xff]   ;;  %v1338_v9 = vld [vmem:[#allocation7 + $0x48] ss:$12 sps:$4 sm:$0xff]  }
  0x5f   :  { %292 = vmatprep.subr.bf16.mxu0 %v1330_v4  ;;  %vm110_vm1 = vcmask 101376   ;;  %v1351_v12 = vld [vmem:[#allocation7 + $0x8] ss:$12 sps:$4 sm:$0xff]   ;;  %v1339_v13 = vld [vmem:[#allocation7 + $0x64] ss:$12 sps:$4 sm:$0xff]   ;;  %vm1101_vm2 = vcmask 64512  }
  0x60   :  { %111 = vst.msk [vmem:[#allocation2] sm:$0xf] %vm110_vm1, %v109_v11  ;;  %1261 = vmatpush3.bf16.msra.mxu1 %v1351_v12  ;;  %v1352_v14 = vld [vmem:[#allocation7 + $0x20] ss:$12 sps:$4 sm:$0xff]   ;;  %v1342_v16 = vld [vmem:[#allocation7 + $0x7c] ss:$12 sps:$4 sm:$0xff]   ;;  %v147_v12 = vlaneseq }
  0x61   :  { %1262 = vmatprep.subr.bf16.mxu1 %v1610_v0  ;;  %v1341_v15 = vld [vmem:[#allocation7 + $0x60] ss:$12 sps:$4 sm:$0xff]   ;;  %v1353_v17 = vld [vmem:[#allocation7 + $0x38] ss:$12 sps:$4 sm:$0xff]   ;;  %v1354_v20 = vld [vmem:[#allocation7 + $0x50] ss:$12 sps:$4 sm:$0xff]  }
  0x62   :  { %293 = vmatpush1.bf16.msra.mxu0 %v1332_v5  ;;  %v1344_v18 = vld [vmem:[#allocation7 + $0x78] ss:$12 sps:$4 sm:$0xff]   ;;  %v1345_v19 = vld [vmem:[#allocation7 + $0x94] ss:$12 sps:$4 sm:$0xff]   ;;  %v1347_v21 = vld [vmem:[#allocation7 + $0x90] ss:$12 sps:$4 sm:$0xff]  }
  0x63   :  { %294 = vmatprep.subr.bf16.mxu0 %v1333_v6  ;;  %v1348_v22 = vld [vmem:[#allocation7 + $0xac] ss:$12 sps:$4 sm:$0xff]   ;;  %v1355_v23 = vld [vmem:[#allocation7 + $0x68] ss:$12 sps:$4 sm:$0xff]   ;;  %v1358_v33 = vld [vmem:[#allocation7 + $0xb0] ss:$12 sps:$4 sm:$0xff]  }
  0x64   :  { %1263 = vmatpush3.bf16.msra.mxu1 %v1352_v14  ;;  %v1350_v24 = vld [vmem:[#allocation7 + $0xa8] ss:$12 sps:$4 sm:$0xff]   ;;  %v1361_v25 = vld [vmem:[#allocation9 + $0x4] ss:$8 sps:$4 sm:$0xff]   ;;  %v1362_v31 = vld [vmem:[#allocation9 + $0x10] ss:$8 sps:$4 sm:$0xff]  }
  0x65   :  { %1264 = vmatprep.subr.bf16.mxu1 %v1610_v0  ;;  %v1356_v26 = vld [vmem:[#allocation7 + $0x80] ss:$12 sps:$4 sm:$0xff]   ;;  %v1364_v29 = vld [vmem:[#allocation9 + $0x14] ss:$8 sps:$4 sm:$0xff]   ;;  %v1357_v30 = vld [vmem:[#allocation7 + $0x98] ss:$12 sps:$4 sm:$0xff]  }
  0x66   :  { %295 = vmatpush1.bf16.msra.mxu0 %v1335_v7  ;;  %v1359_v27 = vld [vmem:[#allocation9] ss:$8 sps:$4 sm:$0xff]   ;;  %v1367_v32 = vld [vmem:[#allocation9 + $0x24] ss:$8 sps:$4 sm:$0xff]   ;;  %v1370_v35 = vld [vmem:[#allocation9 + $0x34] ss:$8 sps:$4 sm:$0xff]  }
  0x67   :  { %296 = vmatprep.subr.bf16.mxu0 %v1336_v8  ;;  %v112_v28 = vld [vmem:[#allocation2] sm:$0xf]  ;;  %v1365_v34 = vld [vmem:[#allocation9 + $0x20] ss:$8 sps:$4 sm:$0xff]   ;;  %v1368_v36 = vld [vmem:[#allocation9 + $0x30] ss:$8 sps:$4 sm:$0xff]  }
  0x68   :  { %1265 = vmatpush3.bf16.msra.mxu1 %v1353_v17  ;;  %v1373_v37 = vld [vmem:[#allocation9 + $0x44] ss:$8 sps:$4 sm:$0xff]   ;;  %v1371_v38 = vld [vmem:[#allocation9 + $0x40] ss:$8 sps:$4 sm:$0xff]   ;;  %v1376_v39 = vld [vmem:[#allocation9 + $0x54] ss:$8 sps:$4 sm:$0xff]  }
  0x69   :  { %1266 = vmatprep.subr.bf16.mxu1 %v1610_v0  ;;  %v1374_v40 = vld [vmem:[#allocation9 + $0x50] ss:$8 sps:$4 sm:$0xff]   ;;  %v1379_v41 = vld [vmem:[#allocation9 + $0x64] ss:$8 sps:$4 sm:$0xff]   ;;  %v1377_v42 = vld [vmem:[#allocation9 + $0x60] ss:$8 sps:$4 sm:$0xff]  }
  0x6a   :  { %297 = vmatpush1.bf16.msra.mxu0 %v1338_v9  ;;  %v1382_v43 = vld [vmem:[#allocation9 + $0x74] ss:$8 sps:$4 sm:$0xff]   ;;  %v1380_v44 = vld [vmem:[#allocation9 + $0x70] ss:$8 sps:$4 sm:$0xff]   ;;  %v1385_v45 = vld [vmem:[#allocation9 + $0x84] ss:$8 sps:$4 sm:$0xff]  }
  0x6b   :  { %298 = vmatprep.subr.bf16.mxu0 %v1339_v13  ;;  %v1383_v46 = vld [vmem:[#allocation9 + $0x80] ss:$8 sps:$4 sm:$0xff]   ;;  %v1388_v47 = vld [vmem:[#allocation9 + $0x94] ss:$8 sps:$4 sm:$0xff]   ;;  %v1386_v48 = vld [vmem:[#allocation9 + $0x90] ss:$8 sps:$4 sm:$0xff]  }
  0x6c   :  { %1267 = vmatpush3.bf16.msra.mxu1 %v1354_v20  ;;  %v1391_v49 = vld [vmem:[#allocation9 + $0xa4] ss:$8 sps:$4 sm:$0xff]   ;;  %v1389_v50 = vld [vmem:[#allocation9 + $0xa0] ss:$8 sps:$4 sm:$0xff]   ;;  %v1394_v51 = vld [vmem:[#allocation9 + $0xb4] ss:$8 sps:$4 sm:$0xff]  }
  0x6d   :  { %1268 = vmatprep.subr.bf16.mxu1 %v1610_v0  ;;  %v1392_v52 = vld [vmem:[#allocation9 + $0xb0] ss:$8 sps:$4 sm:$0xff]   ;;  %v1397_v53 = vld [vmem:[#allocation9 + $0xc4] ss:$8 sps:$4 sm:$0xff]   ;;  %v1395_v54 = vld [vmem:[#allocation9 + $0xc0] ss:$8 sps:$4 sm:$0xff]  }
  0x6e   :  { %299 = vmatpush1.bf16.msra.mxu0 %v1341_v15  ;;  %v1400_v55 = vld [vmem:[#allocation9 + $0xd4] ss:$8 sps:$4 sm:$0xff]   ;;  %v1398_v56 = vld [vmem:[#allocation9 + $0xd0] ss:$8 sps:$4 sm:$0xff]   ;;  %v1403_v57 = vld [vmem:[#allocation9 + $0xe4] ss:$8 sps:$4 sm:$0xff]  }
  0x6f   :  { %300 = vmatprep.subr.bf16.mxu0 %v1342_v16  ;;  %v1401_v58 = vld [vmem:[#allocation9 + $0xe0] ss:$8 sps:$4 sm:$0xff]   ;;  %v1406_v59 = vld [vmem:[#allocation9 + $0xf4] ss:$8 sps:$4 sm:$0xff]   ;;  %v1404_v60 = vld [vmem:[#allocation9 + $0xf0] ss:$8 sps:$4 sm:$0xff]  }
  0x70   :  { %1269 = vmatpush3.bf16.msra.mxu1 %v1355_v23  ;;  %v1409_v61 = vld [vmem:[#allocation9 + $0x104] ss:$8 sps:$4 sm:$0xff]   ;;  %v1435_v4 = vld [vmem:[#allocation10 + $0x50] sm:$0xff]   ;;  %v1437_v6 = vld [vmem:[#allocation10 + $0x58] sm:$0xff]   ;;  %v1759_v13 = vshrl.u32 %v147_v12, 7 }
  0x71   :  { %1270 = vmatprep.subr.bf16.mxu1 %v1610_v0  ;;  %v1431_v62 = vld [vmem:[#allocation10 + $0x40] sm:$0xff]   ;;  %v1433_v2 = vld [vmem:[#allocation10 + $0x48] sm:$0xff]   ;;  %v1436_v5 = vld [vmem:[#allocation10 + $0x10] sm:$0xff]  }
  0x72   :  { %301 = vmatpush1.bf16.msra.mxu0 %v1344_v18  ;;  %v1432_v63 = vld [vmem:[#allocation10] sm:$0xff]   ;;  %v1434_v3 = vld [vmem:[#allocation10 + $0x8] sm:$0xff]   ;;  %v1438_v7 = vld [vmem:[#allocation10 + $0x18] sm:$0xff]   ;;  %v149_v14 = vsub.s32 0, %v1759_v13  ;;  %v153_v16 = vsub.s32 1, %v1759_v13 }
  0x73   :  { %302 = vmatprep.subr.bf16.mxu0 %v1345_v19  ;;  %v1439_v8 = vld [vmem:[#allocation10 + $0x60] sm:$0xff]   ;;  %v1441_v10 = vld [vmem:[#allocation10 + $0x68] sm:$0xff]   ;;  %v145_v15 = vld [vmem:[%s1818_s2] sm:$0x7] }
  0x74   :  { %1271 = vmatpush3.bf16.msra.mxu1 %v1356_v26  ;;  %v1440_v9 = vld [vmem:[#allocation10 + $0x20] sm:$0xff]   ;;  %v1442_v11 = vld [vmem:[#allocation10 + $0x28] sm:$0xff]   ;;  %v150_v17 = vrot.slane %v145_v15, %v149_v14  ;;  %v154_v18 = vrot.slane %v145_v15, %v153_v16 }
  0x75   :  { %1272 = vmatprep.subr.bf16.mxu1 %v1610_v0  ;;  %v1452_v12 = vld [vmem:[#allocation12 + $0x28] sm:$0xff]  }
  0x76   :  { %303 = vmatpush1.bf16.msra.mxu0 %v1347_v21 }
  0x77   :  { %304 = vmatprep.subr.bf16.mxu0 %v1348_v22 }
  0x78   :  { %1273 = vmatpush3.bf16.msra.mxu1 %v1357_v30  ;;  %v1412_v30 = vld [vmem:[#allocation9 + $0x114] ss:$8 sps:$4 sm:$0xff]  }
  0x79   :  { %1274 = vmatprep.subr.bf16.mxu1 %v1610_v0 }
  0x7a   :  { %305 = vmatpush1.bf16.msra.mxu0 %v1350_v24 }
  0x7b   :  { %677 = vmatprep.subr.bf16.mxu0 %v1361_v25 }
  0x7c   :  { %1275 = vmatpush3.bf16.msra.mxu1 %v1358_v33  ;;  %v1415_v33 = vld [vmem:[#allocation9 + $0x124] ss:$8 sps:$4 sm:$0xff]  }
  0x7d   :  { %323 = vmatmul.mubr.bf16.vlgmr.msra.gmra.mrb[0].mxu0 %v112_v28  ;;  %1227 = vmatprep.subr.bf16.mxu1 %v1431_v62 }
  0x7e   :  { %678 = vmatpush1.bf16.msra.mxu0 %v1359_v27 }
  0x7f   :  { %679 = vmatprep.subr.bf16.mxu0 %v1364_v29  ;;  %1277 = vmatmul.mubr.bf16.vlgmr.msra.gmra.mrb[0].mxu1 %v112_v28  ;;  %v1407_v28 = vld [vmem:[#allocation9 + $0x100] ss:$8 sps:$4 sm:$0xff]  }
  0x80   :  { %1228 = vmatpush3.bf16.msra.mxu1 %v1432_v63 }
  0x81   :  { %1229 = vmatprep.subr.bf16.mxu1 %v1433_v2 }
  0x82   :  { %680 = vmatpush1.bf16.msra.mxu0 %v1362_v31  ;;  %v1410_v31 = vld [vmem:[#allocation9 + $0x110] ss:$8 sps:$4 sm:$0xff]  }
  0x83   :  { %681 = vmatprep.subr.bf16.mxu0 %v1367_v32 }
  0x84   :  { %1230 = vmatpush3.bf16.msra.mxu1 %v1434_v3 }
  0x85   :  { %1231 = vmatprep.subr.bf16.mxu1 %v1435_v4 }
  0x86   :  { %682 = vmatpush1.bf16.msra.mxu0 %v1365_v34 }
  0x87   :  { %683 = vmatprep.subr.bf16.mxu0 %v1370_v35 }
  0x88   :  { %1232 = vmatpush3.bf16.msra.mxu1 %v1436_v5 }
  0x89   :  { %1233 = vmatprep.subr.bf16.mxu1 %v1437_v6  ;;  %v1447_v6 = vld [vmem:[#allocation12] sm:$0xff]  }
  0x8a   :  { %684 = vmatpush1.bf16.msra.mxu0 %v1368_v36 }
  0x8b   :  { %685 = vmatprep.subr.bf16.mxu0 %v1373_v37  ;;  %v1413_v37 = vld [vmem:[#allocation9 + $0x120] ss:$8 sps:$4 sm:$0xff]  }
  0x8c   :  { %1234 = vmatpush3.bf16.msra.mxu1 %v1438_v7 }
  0x8d   :  { %1235 = vmatprep.subr.bf16.mxu1 %v1439_v8  ;;  %v1448_v8 = vld [vmem:[#allocation12 + $0x8] sm:$0xff]  }
  0x8e   :  { %686 = vmatpush1.bf16.msra.mxu0 %v1371_v38  ;;  %v1418_v38 = vld [vmem:[#allocation9 + $0x134] ss:$8 sps:$4 sm:$0xff]  }
  0x8f   :  { %687 = vmatprep.subr.bf16.mxu0 %v1376_v39  ;;  %v1416_v39 = vld [vmem:[#allocation9 + $0x130] ss:$8 sps:$4 sm:$0xff]  }
  0x90   :  { %1236 = vmatpush3.bf16.msra.mxu1 %v1440_v9  ;;  %v1449_v9 = vld [vmem:[#allocation12 + $0x10] sm:$0xff]  }
  0x91   :  { %1237 = vmatprep.subr.bf16.mxu1 %v1441_v10  ;;  %v1450_v10 = vld [vmem:[#allocation12 + $0x18] sm:$0xff]  }
  0x92   :  { %688 = vmatpush1.bf16.msra.mxu0 %v1374_v40  ;;  %v1421_v40 = vld [vmem:[#allocation9 + $0x144] ss:$8 sps:$4 sm:$0xff]  }
  0x93   :  { %689 = vmatprep.subr.bf16.mxu0 %v1379_v41  ;;  %v157_v41 = vsub.s32 2, %v1759_v13  ;;  %v1453_v13 = vld [vmem:[#allocation12 + $0x30] sm:$0xff]  }
  0x94   :  { %1238 = vmatpush3.bf16.msra.mxu1 %v1442_v11  ;;  %v1451_v11 = vld [vmem:[#allocation12 + $0x20] sm:$0xff]  }
  0x96   :  { %690 = vmatpush1.bf16.msra.mxu0 %v1377_v42  ;;  %v1419_v42 = vld [vmem:[#allocation9 + $0x140] ss:$8 sps:$4 sm:$0xff]  }
  0x97   :  { %691 = vmatprep.subr.bf16.mxu0 %v1382_v43  ;;  %v1424_v43 = vld [vmem:[#allocation9 + $0x154] ss:$8 sps:$4 sm:$0xff]  }
  0x9a   :  { %692 = vmatpush1.bf16.msra.mxu0 %v1380_v44  ;;  %v1422_v44 = vld [vmem:[#allocation9 + $0x150] ss:$8 sps:$4 sm:$0xff]  }
  0x9b   :  { %693 = vmatprep.subr.bf16.mxu0 %v1385_v45  ;;  %v1427_v45 = vld [vmem:[#allocation9 + $0x164] ss:$8 sps:$4 sm:$0xff]  }
  0x9e   :  { %694 = vmatpush1.bf16.msra.mxu0 %v1383_v46 }
  0x9f   :  { %695 = vmatprep.subr.bf16.mxu0 %v1388_v47  ;;  %v1425_v47 = vld [vmem:[#allocation9 + $0x160] ss:$8 sps:$4 sm:$0xff]  }
  0xa2   :  { %696 = vmatpush1.bf16.msra.mxu0 %v1386_v48  ;;  %v1430_v48 = vld [vmem:[#allocation9 + $0x174] ss:$8 sps:$4 sm:$0xff]  }
  0xa3   :  { %697 = vmatprep.subr.bf16.mxu0 %v1391_v49 }
  0xa6   :  { %698 = vmatpush1.bf16.msra.mxu0 %v1389_v50  ;;  %v1428_v50 = vld [vmem:[#allocation9 + $0x170] ss:$8 sps:$4 sm:$0xff]  }
  0xa7   :  { %699 = vmatprep.subr.bf16.mxu0 %v1394_v51 }
  0xaa   :  { %700 = vmatpush1.bf16.msra.mxu0 %v1392_v52  ;;  %v1443_v52 = vld [vmem:[#allocation10 + $0x70] sm:$0xff]  }
  0xab   :  { %701 = vmatprep.subr.bf16.mxu0 %v1397_v53  ;;  %v1444_v53 = vld [vmem:[#allocation10 + $0x30] sm:$0xff]   ;;  %1239 = vmatprep.subr.bf16.mxu1 %v1443_v52 }
  0xac   :  { %1240 = vmatpush3.bf16.msra.mxu1 %v1444_v53 }
  0xae   :  { %702 = vmatpush1.bf16.msra.mxu0 %v1395_v54  ;;  %v1445_v54 = vld [vmem:[#allocation10 + $0x78] sm:$0xff]  }
  0xaf   :  { %703 = vmatprep.subr.bf16.mxu0 %v1400_v55  ;;  %v1446_v55 = vld [vmem:[#allocation10 + $0x38] sm:$0xff]   ;;  %1241 = vmatprep.subr.bf16.mxu1 %v1445_v54 }
  0xb0   :  { %1242 = vmatpush3.bf16.msra.mxu1 %v1446_v55 }
  0xb1   :  { %1280 = vmatprep.subr.bf16.mxu1 %v1610_v0 }
  0xb2   :  { %704 = vmatpush1.bf16.msra.mxu0 %v1398_v56  ;;  %v425_v56 = vld [vmem:[%s1820_s4] sm:$0x3] }
  0xb3   :  { %705 = vmatprep.subr.bf16.mxu0 %v1403_v57  ;;  %v430_v57 = vrot.slane %v425_v56, %v149_v14  ;;  %v1454_v14 = vld [vmem:[#allocation12 + $0x38] sm:$0xff]  }
  0xb6   :  { %706 = vmatpush1.bf16.msra.mxu0 %v1401_v58  ;;  %v434_v58 = vrot.slane %v425_v56, %v153_v16  ;;  %v1192_v16 = vld [vmem:[%s1822_s6] ss:$0 sm:$0xff] }
  0xb7   :  { %707 = vmatprep.subr.bf16.mxu0 %v1406_v59 }
  0xba   :  { %708 = vmatpush1.bf16.msra.mxu0 %v1404_v60 }
  0xbb   :  { %718 = vmatprep.subr.bf16.mxu0 %v1409_v61 }
 0x150   :  { %v324_v19 = vpop.f32.mrb[0].mxu0 }
 0x151   :  { %v325_v20 = vadd.f32 %v324_v19, %v150_v17  ;;  %v326_v21 = vpop.f32.mrb[1].mxu0 }
 0x152   :  { %v327_v22 = vadd.f32 %v326_v21, %v154_v18  ;;  %v328_v23 = vpop.f32.mrb[2].mxu0  ;;  %v365_v32 = vpop.f32.mrb[0].mxu1 }
 0x153   :  { %v371_v24 = vmax.f32 %v325_v20, 0.0  ;;  %v329_v25 = vpop.f32.mrb[3].mxu0  ;;  %v1278_v34 = vpop.f32.mrb[1].mxu1 }
 0x154   :  { %v372_v26 = vmax.f32 %v327_v22, 0.0  ;;  %v368_v35 = vpop.f32.mrb[2].mxu1 }
 0x155   :  { %v374_v29 = vpack.c.bf16 %v371_v24, %v371_v24  ;;  %v1279_v36 = vpop.f32.mrb[3].mxu1  ;;  %v1209_v24 = vld [vmem:[%s1824_s8] ss:$0 sm:$0xff]  ;;  %s1613_s8 = smov [#allocation13]  }
 0x156   :  { %v375_v27 = vpack.c.bf16 %v372_v26, %v372_v26  ;;  %s1109_s26 = sshll.u32 %s1613_s8, 4  ;;  %s1110_s26 = int_to_ptr.vmem [resolvable:$true] %s1109_s26 }
 0x157   :  { %p1574_p13 = scmp.lt.s32.totalorder %s1110_s26, %s1110_s26 }
 0x158   :  { %709 = vmatprep.mubr.bf16.mxu0 %v375_v27 }
 0x159   :  { %710 = vmatmul.mubr.bf16.vlgmr.msra.gmra.mrb[4].mxu0 %v374_v29 }
 0x15a   :  { %719 = vmatpush1.bf16.msra.mxu0 %v1407_v28  ;;  %750 = vmatprep.mubr.bf16.mxu0 %v1611_v1  ;;  %v158_v1 = vrot.slane %v145_v15, %v157_v41 }
 0x15b   :  { %720 = vmatprep.subr.bf16.mxu0 %v1412_v30 }
 0x15c   :  { %v366_v46 = vadd.f32 %v365_v32, %v158_v1  ;;  %v1053_v32 = vld [vmem:[%s1825_s9] sm:$0xf]  ;;  %s1569_s9 = scalar_lea.vmem %s1110_s26, 128 }
 0x15d   :  { %p1570_p12 = scmp.ne.s32.totalorder %s1110_s26, %s1569_s9  ;;  %p1575_p0 = scmp.lt.s32.totalorder %s1569_s9, %s1569_s9 }
 0x15e   :  { %721 = vmatpush1.bf16.msra.mxu0 %v1410_v31  ;;  %v373_v49 = vmax.f32 %v366_v46, 0.0 }
 0x15f   :  { %722 = vmatprep.subr.bf16.mxu0 %v1415_v33  ;;  %p1576_p1 = por %p1575_p0, %p1574_p13 }
 0x160   :  { %v376_v51 = vpack.c.bf16 %v373_v49, %v373_v49 }
 0x161   :  { %p1577_p2 = pnand %p1576_p1, %p1570_p12 }
 0x162   :  { %723 = vmatpush1.bf16.msra.mxu0 %v1413_v37 }
 0x163   :  { %724 = vmatprep.subr.bf16.mxu0 %v1418_v38 }
 0x166   :  { %725 = vmatpush1.bf16.msra.mxu0 %v1416_v39 }
 0x167   :  { %726 = vmatprep.subr.bf16.mxu0 %v1421_v40 }
 0x16a   :  { %727 = vmatpush1.bf16.msra.mxu0 %v1419_v42 }
 0x16b   :  { %728 = vmatprep.subr.bf16.mxu0 %v1424_v43 }
 0x16e   :  { %729 = vmatpush1.bf16.msra.mxu0 %v1422_v44 }
 0x16f   :  { %730 = vmatprep.subr.bf16.mxu0 %v1427_v45 }
 0x172   :  { %731 = vmatpush1.bf16.msra.mxu0 %v1425_v47 }
 0x173   :  { %732 = vmatprep.subr.bf16.mxu0 %v1430_v48 }
 0x176   :  { %733 = vmatpush1.bf16.msra.mxu0 %v1428_v50 }
 0x179   :  { %751 = vmatmul.mubr.bf16.vlgmr.msra.gmra.mrb[4].mxu0 %v376_v51 }
 0x24c   :  { %v752_v59 = vpop.f32.mrb[4].mxu0 }
 0x24d   :  { %v1306_v60 = vadd.f32 %v752_v59, %v430_v57  ;;  %v754_v61 = vpop.f32.mrb[5].mxu0 }
 0x24e   :  { %v1307_v62 = vadd.f32 %v754_v61, %v434_v58  ;;  %v756_v63 = vpop.f32.mrb[6].mxu0 }
 0x24f   :  { %v759_v2 = vmax.f32 %v1306_v60, 0.0  ;;  %v757_v3 = vpop.f32.mrb[7].mxu0 }
 0x250   :  { %v760_v4 = vmax.f32 %v1307_v62, 0.0 }
 0x251   :  { %v761_v7 = vpack.c.bf16 %v759_v2, %v759_v2 }
 0x252   :  { %v762_v5 = vpack.c.bf16 %v760_v4, %v760_v4 }
 0x254   :  { %930 = vmatprep.mubr.bf16.mxu1 %v762_v5 }
 0x255   :  { %931 = vmatmul.mubr.bf16.vlgmr.msra.gmra.mrb[4].mxu1 %v761_v7 }
 0x256   :  { %1281 = vmatpush3.bf16.msra.mxu1 %v1447_v6  ;;  %1296 = vmatprep.mubr.msk.bf16.mxu1 %vm1612_vm0, %v1610_v0 }
 0x257   :  { %1282 = vmatprep.subr.bf16.mxu1 %v1610_v0 }
 0x25a   :  { %1283 = vmatpush3.bf16.msra.mxu1 %v1448_v8 }
 0x25b   :  { %1284 = vmatprep.subr.bf16.mxu1 %v1610_v0 }
 0x25e   :  { %1285 = vmatpush3.bf16.msra.mxu1 %v1449_v9 }
 0x25f   :  { %1286 = vmatprep.subr.bf16.mxu1 %v1610_v0 }
 0x262   :  { %1287 = vmatpush3.bf16.msra.mxu1 %v1450_v10 }
 0x263   :  { %1288 = vmatprep.subr.bf16.mxu1 %v1610_v0 }
 0x266   :  { %1289 = vmatpush3.bf16.msra.mxu1 %v1451_v11 }
 0x267   :  { %1290 = vmatprep.subr.bf16.mxu1 %v1610_v0 }
 0x26a   :  { %1291 = vmatpush3.bf16.msra.mxu1 %v1452_v12 }
 0x26b   :  { %1292 = vmatprep.subr.bf16.mxu1 %v1610_v0 }
 0x26e   :  { %1293 = vmatpush3.bf16.msra.mxu1 %v1453_v13 }
 0x26f   :  { %1294 = vmatprep.subr.bf16.mxu1 %v1610_v0 }
 0x272   :  { %1295 = vmatpush3.bf16.msra.mxu1 %v1454_v14 }
 0x273   :  { %1300 = vmatprep.subr.bf16.mxu1 %v1610_v0 }
 0x328   :  { %v1243_v15 = vpop.f32.mrb[4].mxu1 }
 0x329   :  { %v1244_v17 = vpop.f32.mrb[5].mxu1 }
 0x32a   :  { %v1245_v18 = vadd.f32 %v1244_v17, %v1243_v15  ;;  %v1246_v19 = vpop.f32.mrb[6].mxu1 }
 0x32b   :  { %v1247_v20 = vpop.f32.mrb[7].mxu1 }
 0x32c   :  { %v933_v21 = vadd.f32 %v1245_v18, %v1192_v16 }
 0x32e   :  { %v938_v22 = vmax.f32 %v933_v21, 0.0 }
 0x330   :  { %v939_v23 = vpack.c.bf16 %v938_v22, %v938_v22 }
 0x332   :  { %1297 = vmatmul.mubr.bf16.vlgmr.msra.gmra.mrb[8].mxu1 %v939_v23 }
 0x333   :  { %1302 = vmatprep.mubr.msk.bf16.mxu1 %vm1612_vm0, %v1610_v0  ;;  %v1055_v0 = vstv %s1826_s10 }
 0x405   :  { %v1045_v25 = vpop.f32.mrb[8].mxu1 }
 0x406   :  { %v1046_v26 = vadd.f32 %v1209_v24, %v1045_v25  ;;  %v1298_v27 = vpop.f32.mrb[9].mxu1 }
 0x407   :  { %v1048_v28 = vpop.f32.mrb[10].mxu1 }
 0x408   :  { %v1051_v29 = vmax.f32 %v1046_v26, 0.0  ;;  %v1299_v30 = vpop.f32.mrb[11].mxu1 }
 0x40a   :  { %v1052_v31 = vpack.c.bf16 %v1051_v29, %v1051_v29 }
 0x40c   :  { %1301 = vmatpush3.bf16.xpose.msra.mxu1 %v1052_v31 }
 0x413   :  { %1303 = vmatmul.mubr.bf16.vlgmr.msra.gmra.mrb[12].mxu1 %v1053_v32 }
 0x4e6   :  { %v1090_v33 = vpop.f32.mrb[12].mxu1 }
 0x4e7   :  { %v1091_v34 = vadd.f32 %v1090_v33, %v1055_v0  ;;  %v1304_v35 = vpop.f32.mrb[13].mxu1 }
 0x4e8   :  { %v1093_v36 = vpop.f32.mrb[14].mxu1 }
 0x4e9   :  { %v1096_v37 = vsub.f32 0.0, %v1091_v34  ;;  %v1305_v38 = vpop.f32.mrb[15].mxu1 }
 0x4eb   :  { %v1097_v39 = vmul.f32 1.442695, %v1096_v37 }
 0x4ed   :  { %1455 = vpow2.f32 %v1097_v39 }
 0x4f7   :  { %v1456_v40 = vpop.eup %1455 }
 0x4f8   :  { %v1099_v41 = vadd.f32 1.0, %v1456_v40 }
 0x4fa   :  { %1457 = vrcp.f32 %v1099_v41 }
 0x504   :  { %v1458_v42 = vpop.eup %1457 }
 0x505   :  { %1102 = vst.msk [vmem:[#allocation13] sm:$0xff] %vm1101_vm2, %v1458_v42 }
 0x506   :  { %1580 = shalt.err (!%p1577_p2)
}
 0x507   :  { %s1581_s12 = scalar_lea.hbm %s1827_s11, 128 }
 0x508   :  { %p1582_p3 = scmp.ne.s32.totalorder %s1827_s11, %s1581_s12  ;;  %p1585_p4 = scmp.lt.u32.totalorder %s1581_s12, %s1827_s11 }
 0x50a   :  { %p1587_p5 = pnand %p1585_p4, %p1582_p3 }
 0x50c   :  { %1590 = shalt.err (!%p1587_p5)
}
 0x50d   :  { %1112 = dma.vmem_to_hbm [thread:$0]  %s1110_s26, 128, %s1827_s11, [#allocation6]  }
 0x50e   :  { %1597 = dma.done.wait [#allocation6], 128  }
 0x50f   :  { %1598 = vsyncadd [#allocation6], 4294967168 }
 0x510   :  { %1116 = vsyncpa [#allocation5], 1 }
 0x511   :  { %1117 = vsyncpa [#allocation8], 1 }
 0x512   :  { %1118 = vsyncpa [#allocation11], 1 }
 0x513   :  { %1119 = vsyncpa [#allocation6], 1 }

</bundles_post_ra>
